<compile_context>
chip_gen: v6e
topology: v6e:2x2x1
jax: 0.10.0
libtpu: 0.0.40
codegen_flags: <defaults>
</compile_context>

<pallas_src>
import jax
import jax.numpy as jnp
from jax.experimental import pallas as pl
from jax.experimental.pallas import tpu as pltpu


def _round_up(x: int, m: int) -> int:
    return ((x + m - 1) // m) * m


# ----------------------------------------------------------------------------
# Pallas kernel: Gaussian-likelihood MLP decoder + reparameterized sample
# ----------------------------------------------------------------------------
def _make_decoder_kernel(n_layers: int, n_phenos: int, compute_dtype):
    """Kernel for one (TM,) row-tile of one particle.

    Ref order: z, D, eps, [w0z, w0d, b0, (w_i, b_i) for i=1..n_layers-1,
    w_heads, b_heads], out.
    """

    def kernel(z_ref, d_ref, eps_ref, *rest):
        *w_refs, out_ref = rest

        z = z_ref[...]            # (TM, n_latent)   f32 or bf16
        d = d_ref[...]            # (TM, n_treat)    f32 or bf16
        w0z = w_refs[0][...]
        w0d = w_refs[1][...]
        b0 = w_refs[2][...]       # (1, hidden) f32

        # split first-layer matmul: z @ w0[:n_latent] + D @ w0[n_latent:] + b0
        h = (jnp.dot(z, w0z, preferred_element_type=jnp.float32)
             + jnp.dot(d, w0d, preferred_element_type=jnp.float32)
             + b0)
        h = jnp.where(h > 0, h, 0.01 * h)          # LeakyReLU(0.01), f32

        idx = 3
        for _ in range(n_layers - 1):
            w = w_refs[idx][...]
            b = w_refs[idx + 1][...]
            idx += 2
            h = jnp.dot(h.astype(compute_dtype), w,
                        preferred_element_type=jnp.float32) + b
            h = jnp.where(h > 0, h, 0.01 * h)

        # fused heads: one matmul producing [mean | log_var]  (TM, 2*n_phenos)
        w_heads = w_refs[idx][...]
        b_heads = w_refs[idx + 1][...]
        heads = jnp.dot(h.astype(compute_dtype), w_heads,
                        preferred_element_type=jnp.float32) + b_heads

        mean = heads[:, :n_phenos]
        log_var = heads[:, n_phenos:]
        scale = jnp.exp(0.5 * log_var)
        x = mean + scale * eps_ref[...]            # reparameterized Normal sample

        # single lane-concatenated store: [mean | scale | x]
        out_ref[...] = jnp.concatenate([mean, scale, x], axis=-1)

    return kernel


def decoder_pallas(z, D, eps, params, *, n_layers, n_latent, n_phenos,
                   compute_dtype=jnp.float32, block_rows=512):
    """Run the decoder on z:(P,n,n_latent), D:(n,n_treat), eps:(P,n,n_phenos).

    Returns (mean, scale, x_sample), each (P, n, n_phenos) float32.
    """
    assert n_layers >= 1
    P, n, _ = z.shape
    n_treat = D.shape[-1]

    # Row tile: multiple of 8 sublanes, at most block_rows (sized for v7x's
    # 64 MiB VMEM with plenty of headroom at these feature widths).
    tm = min(int(block_rows), _round_up(n, 8))
    tm = _round_up(tm, 8)
    n_pad = _round_up(n, tm)
    if n_pad != n:
        pad = n_pad - n
        z = jnp.pad(z, ((0, 0), (0, pad), (0, 0)))
        D = jnp.pad(D, ((0, pad), (0, 0)))
        eps = jnp.pad(eps, ((0, 0), (0, pad), (0, 0)))

    wdt = compute_dtype
    w0 = params["w0"]
    weight_ops = [
        w0[:n_latent].astype(wdt),          # w0z
        w0[n_latent:].astype(wdt),          # w0d
        params["b0"].astype(jnp.float32),
    ]
    for i in range(1, n_layers):
        weight_ops += [params[f"w{i}"].astype(wdt),
                       params[f"b{i}"].astype(jnp.float32)]
    w_heads = jnp.concatenate([params["wm"], params["wv"]], axis=1).astype(wdt)
    b_heads = jnp.concatenate([params["bm"], params["bv"]], axis=1).astype(jnp.float32)
    weight_ops += [w_heads, b_heads]

    z_in = z.astype(wdt) if wdt != jnp.float32 else z
    D_in = D.astype(wdt) if wdt != jnp.float32 else D

    row_map = lambda p, i: (p, i, 0)     # per-particle, per-row-tile blocks
    d_map = lambda p, i: (i, 0)          # D re-used across particles (no HBM bcast)
    const_map = lambda p, i: (0, 0)      # weights stay VMEM-resident

    in_specs = [
        pl.BlockSpec((None, tm, n_latent), row_map),
        pl.BlockSpec((tm, n_treat), d_map),
        pl.BlockSpec((None, tm, n_phenos), row_map),
    ] + [pl.BlockSpec(w.shape, const_map) for w in weight_ops]

    out_specs = pl.BlockSpec((None, tm, 3 * n_phenos), row_map)
    out_shape = jax.ShapeDtypeStruct((P, n_pad, 3 * n_phenos), jnp.float32)

    kernel = _make_decoder_kernel(n_layers, n_phenos, compute_dtype)
    packed = pl.pallas_call(
        kernel,
        out_shape=out_shape,
        grid=(P, n_pad // tm),
        in_specs=in_specs,
        out_specs=out_specs,
        compiler_params=pltpu.CompilerParams(
            dimension_semantics=("parallel", "parallel")),
    )(z_in, D_in, eps, *weight_ops)

    packed = packed[:, :n, :]
    mean = packed[..., :n_phenos]
    scale = packed[..., n_phenos:2 * n_phenos]
    x = packed[..., 2 * n_phenos:]
    return mean, scale, x


# ----------------------------------------------------------------------------
# ConditionalVAEModel (JAX side)
# ----------------------------------------------------------------------------
class ConditionalVAEModel:
    def __init__(self, n_latent, n_treatments, n_phenos, likelihood_key,
                 decoder_n_layers, decoder_n_hidden, key,
                 compute_dtype=jnp.float32, block_rows=512):
        # TODO(synk): 'library_nb' (NegBinomial) likelihood head not implemented.
        assert likelihood_key == "normal"
        assert decoder_n_layers >= 1
        self.n_latent = n_latent
        self.n_treatments = n_treatments
        self.n_phenos = n_phenos
        self.likelihood_key = likelihood_key
        self.decoder_n_layers = decoder_n_layers
        self.decoder_n_hidden = decoder_n_hidden
        self.compute_dtype = compute_dtype   # bf16 recommended on v6e/v7x
        self.block_rows = block_rows

        # Deterministic synthetic parameter init (fan-in scaled normal).
        n_input = n_latent + n_treatments
        params = {}
        dims = [n_input] + [decoder_n_hidden] * decoder_n_layers
        keys = jax.random.split(key, decoder_n_layers + 2)
        for i in range(decoder_n_layers):
            fan_in, fan_out = dims[i], dims[i + 1]
            params[f"w{i}"] = (
                jax.random.normal(keys[i], (fan_in, fan_out), jnp.float32)
                / jnp.sqrt(float(fan_in)))
            params[f"b{i}"] = jnp.zeros((1, fan_out), jnp.float32)
        h = dims[-1]
        params["wm"] = (jax.random.normal(keys[-2], (h, n_phenos), jnp.float32)
                        / jnp.sqrt(float(h)))
        params["bm"] = jnp.zeros((1, n_phenos), jnp.float32)
        params["wv"] = (jax.random.normal(keys[-1], (h, n_phenos), jnp.float32)
                        / jnp.sqrt(float(h)))
        params["bv"] = jnp.zeros((1, n_phenos), jnp.float32)
        self.params = params

    def get_var_keys(self):
        return ["z"]

    def forward(self, D, rng_key, condition_values=None, n_particles: int = 1):
        if condition_values is None:
            condition_values = {}
        n = D.shape[0]
        D = D.astype(jnp.float32)

        generative_dists = {}
        samples = {}

        # p_z = Normal(0, 1) over (n, n_latent); represented as (loc, scale)
        generative_dists["p_z"] = (jnp.zeros((n, self.n_latent), jnp.float32),
                                   jnp.ones((n, self.n_latent), jnp.float32))

        key_z, key_x = jax.random.split(rng_key)
        if "z" not in condition_values:
            z = jax.random.normal(key_z, (n_particles, n, self.n_latent), jnp.float32)
        else:
            z = condition_values["z"]
        samples["z"] = z

        # TODO(synk): eps could be generated in-kernel (pltpu.prng_seed +
        # pltpu.stateful_normal) to remove one (P, n, n_phenos) HBM round trip.
        eps = jax.random.normal(key_x, (n_particles, n, self.n_phenos), jnp.float32)

        mean, scale, x = decoder_pallas(
            z, D, eps, self.params,
            n_layers=self.decoder_n_layers,
            n_latent=self.n_latent,
            n_phenos=self.n_phenos,
            compute_dtype=self.compute_dtype,
            block_rows=self.block_rows,
        )

        generative_dists["p_x"] = (mean, scale)  # Normal(mean, scale)
        samples["x"] = x
        return generative_dists, samples


# ----------------------------------------------------------------------------
# Pure-JAX reference decoder (correctness check of the kernel)
# ----------------------------------------------------------------------------
def _decoder_ref(z, D, eps, params, n_layers):
    P, n, _ = z.shape
    D_rep = jnp.broadcast_to(D[None], (P, n, D.shape[-1]))
    h = jnp.concatenate([z, D_rep], axis=-1)
    hp = jax.lax.Precision.HIGHEST
    for i in range(n_layers):
        h = jnp.matmul(h, params[f"w{i}"], precision=hp) + params[f"b{i}"]
        h = jnp.where(h > 0, h, 0.01 * h)
    mean = jnp.matmul(h, params["wm"], precision=hp) + params["bm"]
    log_var = jnp.matmul(h, params["wv"], precision=hp) + params["bv"]
    scale = jnp.exp(0.5 * log_var)
    return mean, scale, mean + scale * eps


if __name__ == "__main__":
    key = jax.random.PRNGKey(0)
    k_param, k_data, k_fwd, k_data2, k_fwd2 = jax.random.split(key, 5)

    n = 8
    n_particles = 2
    n_latent = 8
    n_treatments = 8
    n_phenos = 16
    decoder_n_layers = 2
    decoder_n_hidden = 32

    model = ConditionalVAEModel(
        n_latent=n_latent,
        n_treatments=n_treatments,
        n_phenos=n_phenos,
        likelihood_key="normal",
        decoder_n_layers=decoder_n_layers,
        decoder_n_hidden=decoder_n_hidden,
        key=k_param,
    )

    # ---- 1) f32 mode, single tile per particle: exact-ish check -------------
    D = jax.random.uniform(k_data, (n, n_treatments), jnp.float32)
    gen_dists, samples = model.forward(D, k_fwd, n_particles=n_particles)
    jax.block_until_ready(samples["x"])

    assert samples["z"].shape == (n_particles, n, n_latent)
    assert samples["x"].shape == (n_particles, n, n_phenos)
    assert gen_dists["p_x"][0].shape == (n_particles, n, n_phenos)

    _, key_x_chk = jax.random.split(k_fwd)
    eps_chk = jax.random.normal(key_x_chk, (n_particles, n, n_phenos), jnp.float32)
    m_ref, s_ref, x_ref = _decoder_ref(samples["z"], D, eps_chk,
                                       model.params, decoder_n_layers)
    assert jnp.allclose(gen_dists["p_x"][0], m_ref, atol=3e-5, rtol=3e-5)
    assert jnp.allclose(gen_dists["p_x"][1], s_ref, atol=3e-5, rtol=3e-5)
    assert jnp.allclose(samples["x"], x_ref, atol=3e-5, rtol=3e-5)

    # ---- 2) multi-tile grid + row padding path (n=13, block_rows=8) ---------
    n2 = 13
    D2 = jax.random.uniform(k_data2, (n2, n_treatments), jnp.float32)
    model.block_rows = 8                       # forces grid=(P, 2), pad 13 -> 16
    gen2, samp2 = model.forward(D2, k_fwd2, n_particles=n_particles)
    jax.block_until_ready(samp2["x"])
    _, key_x2 = jax.random.split(k_fwd2)
    eps2 = jax.random.normal(key_x2, (n_particles, n2, n_phenos), jnp.float32)
    m2, s2, x2 = _decoder_ref(samp2["z"], D2, eps2, model.params, decoder_n_layers)
    assert gen2["p_x"][0].shape == (n_particles, n2, n_phenos)
    assert jnp.allclose(gen2["p_x"][0], m2, atol=3e-5, rtol=3e-5)
    assert jnp.allclose(gen2["p_x"][1], s2, atol=3e-5, rtol=3e-5)
    assert jnp.allclose(samp2["x"], x2, atol=3e-5, rtol=3e-5)
    model.block_rows = 512

    # ---- 3) bf16 matmul operands (v6e/v7x recommendation), loose tolerance --
    model.compute_dtype = jnp.bfloat16
    gen3, samp3 = model.forward(D, k_fwd, n_particles=n_particles)
    jax.block_until_ready(samp3["x"])
    assert jnp.allclose(gen3["p_x"][0], m_ref, atol=0.2, rtol=0.2)
    assert jnp.allclose(gen3["p_x"][1], s_ref, atol=0.2, rtol=0.2)
    assert jnp.allclose(samp3["x"], x_ref, atol=0.2, rtol=0.2)
    model.compute_dtype = jnp.float32

    print("KERNEL_OK")
</pallas_src>

<mosaic_0001>
module attributes {stable_mosaic.version = 11 : i64} {
  func.func @kernel(%arg0: i32, %arg1: i32, %arg2: memref<1x8x8xf32, #tpu.memory_space<vmem>>, %arg3: memref<8x8xf32, #tpu.memory_space<vmem>>, %arg4: memref<1x8x16xf32, #tpu.memory_space<vmem>>, %arg5: memref<8x32xf32, #tpu.memory_space<vmem>>, %arg6: memref<8x32xf32, #tpu.memory_space<vmem>>, %arg7: memref<1x32xf32, #tpu.memory_space<vmem>>, %arg8: memref<32x32xf32, #tpu.memory_space<vmem>>, %arg9: memref<1x32xf32, #tpu.memory_space<vmem>>, %arg10: memref<32x32xf32, #tpu.memory_space<vmem>>, %arg11: memref<1x32xf32, #tpu.memory_space<vmem>>, %arg12: memref<1x8x48xf32, #tpu.memory_space<vmem>>) attributes {dimension_semantics = [#tpu.dimension_semantics<parallel>, #tpu.dimension_semantics<parallel>], iteration_bounds = array<i64: 2, 1>, scalar_prefetch = 0 : i64, scratch_operands = 0 : i64, tpu.core_type = #tpu.core_type<tc>, window_params = [{transform_indices = @transform_0, window_bounds = array<i64: 1, 8, 8>}, {transform_indices = @transform_1, window_bounds = array<i64: 8, 8>}, {transform_indices = @transform_2, window_bounds = array<i64: 1, 8, 16>}, {pipeline_mode = #tpu.pipeline_mode<synchronous>, transform_indices = @transform_3, window_bounds = array<i64: 8, 32>}, {pipeline_mode = #tpu.pipeline_mode<synchronous>, transform_indices = @transform_4, window_bounds = array<i64: 8, 32>}, {pipeline_mode = #tpu.pipeline_mode<synchronous>, transform_indices = @transform_5, window_bounds = array<i64: 1, 32>}, {pipeline_mode = #tpu.pipeline_mode<synchronous>, transform_indices = @transform_6, window_bounds = array<i64: 32, 32>}, {pipeline_mode = #tpu.pipeline_mode<synchronous>, transform_indices = @transform_7, window_bounds = array<i64: 1, 32>}, {pipeline_mode = #tpu.pipeline_mode<synchronous>, transform_indices = @transform_8, window_bounds = array<i64: 32, 32>}, {pipeline_mode = #tpu.pipeline_mode<synchronous>, transform_indices = @transform_9, window_bounds = array<i64: 1, 32>}, {transform_indices = @transform_10, window_bounds = array<i64: 1, 8, 48>}]} {
    %c0 = arith.constant 0 : index
    %c0_0 = arith.constant 0 : index
    %c0_1 = arith.constant 0 : index
    %0 = vector.load %arg2[%c0, %c0_0, %c0_1] : memref<1x8x8xf32, #tpu.memory_space<vmem>>, vector<1x8x8xf32>
    %1 = vector.shape_cast %0 : vector<1x8x8xf32> to vector<8x8xf32>
    %c0_2 = arith.constant 0 : index
    %c0_3 = arith.constant 0 : index
    %2 = vector.load %arg3[%c0_2, %c0_3] : memref<8x8xf32, #tpu.memory_space<vmem>>, vector<8x8xf32>
    %c0_4 = arith.constant 0 : index
    %c0_5 = arith.constant 0 : index
    %3 = vector.load %arg5[%c0_4, %c0_5] : memref<8x32xf32, #tpu.memory_space<vmem>>, vector<8x32xf32>
    %c0_6 = arith.constant 0 : index
    %c0_7 = arith.constant 0 : index
    %4 = vector.load %arg6[%c0_6, %c0_7] : memref<8x32xf32, #tpu.memory_space<vmem>>, vector<8x32xf32>
    %c0_8 = arith.constant 0 : index
    %c0_9 = arith.constant 0 : index
    %5 = vector.load %arg7[%c0_8, %c0_9] : memref<1x32xf32, #tpu.memory_space<vmem>>, vector<1x32xf32>
    %cst = arith.constant dense<0.000000e+00> : vector<8x32xf32>
    %6 = tpu.matmul %1, %3, %cst {dimension_numbers = #tpu.dot_dimension_numbers<[1], [0], [0], [1], [0, 0, 1, 1], [], []>} : vector<8x8xf32>, vector<8x32xf32>, vector<8x32xf32> -> vector<8x32xf32>
    %cst_10 = arith.constant dense<0.000000e+00> : vector<8x32xf32>
    %7 = tpu.matmul %2, %4, %cst_10 {dimension_numbers = #tpu.dot_dimension_numbers<[1], [0], [0], [1], [0, 0, 1, 1], [], []>} : vector<8x8xf32>, vector<8x32xf32>, vector<8x32xf32> -> vector<8x32xf32>
    %8 = arith.addf %6, %7 : vector<8x32xf32>
    %9 = vector.broadcast %5 : vector<1x32xf32> to vector<8x32xf32>
    %10 = arith.addf %8, %9 : vector<8x32xf32>
    %cst_11 = arith.constant 0.000000e+00 : f32
    %11 = vector.broadcast %cst_11 : f32 to vector<8x32xf32>
    %12 = arith.cmpf ogt, %10, %11 : vector<8x32xf32>
    %cst_12 = arith.constant 0.00999999977 : f32
    %13 = vector.broadcast %cst_12 : f32 to vector<8x32xf32>
    %14 = arith.mulf %13, %10 : vector<8x32xf32>
    %15 = arith.select %12, %10, %14 : vector<8x32xi1>, vector<8x32xf32>
    %c0_13 = arith.constant 0 : index
    %c0_14 = arith.constant 0 : index
    %16 = vector.load %arg8[%c0_13, %c0_14] : memref<32x32xf32, #tpu.memory_space<vmem>>, vector<32x32xf32>
    %c0_15 = arith.constant 0 : index
    %c0_16 = arith.constant 0 : index
    %17 = vector.load %arg9[%c0_15, %c0_16] : memref<1x32xf32, #tpu.memory_space<vmem>>, vector<1x32xf32>
    %cst_17 = arith.constant dense<0.000000e+00> : vector<8x32xf32>
    %18 = tpu.matmul %15, %16, %cst_17 {dimension_numbers = #tpu.dot_dimension_numbers<[1], [0], [0], [1], [0, 0, 1, 1], [], []>} : vector<8x32xf32>, vector<32x32xf32>, vector<8x32xf32> -> vector<8x32xf32>
    %19 = vector.broadcast %17 : vector<1x32xf32> to vector<8x32xf32>
    %20 = arith.addf %18, %19 : vector<8x32xf32>
    %cst_18 = arith.constant 0.000000e+00 : f32
    %21 = vector.broadcast %cst_18 : f32 to vector<8x32xf32>
    %22 = arith.cmpf ogt, %20, %21 : vector<8x32xf32>
    %cst_19 = arith.constant 0.00999999977 : f32
    %23 = vector.broadcast %cst_19 : f32 to vector<8x32xf32>
    %24 = arith.mulf %23, %20 : vector<8x32xf32>
    %25 = arith.select %22, %20, %24 : vector<8x32xi1>, vector<8x32xf32>
    %c0_20 = arith.constant 0 : index
    %c0_21 = arith.constant 0 : index
    %26 = vector.load %arg10[%c0_20, %c0_21] : memref<32x32xf32, #tpu.memory_space<vmem>>, vector<32x32xf32>
    %c0_22 = arith.constant 0 : index
    %c0_23 = arith.constant 0 : index
    %27 = vector.load %arg11[%c0_22, %c0_23] : memref<1x32xf32, #tpu.memory_space<vmem>>, vector<1x32xf32>
    %cst_24 = arith.constant dense<0.000000e+00> : vector<8x32xf32>
    %28 = tpu.matmul %25, %26, %cst_24 {dimension_numbers = #tpu.dot_dimension_numbers<[1], [0], [0], [1], [0, 0, 1, 1], [], []>} : vector<8x32xf32>, vector<32x32xf32>, vector<8x32xf32> -> vector<8x32xf32>
    %29 = vector.broadcast %27 : vector<1x32xf32> to vector<8x32xf32>
    %30 = arith.addf %28, %29 : vector<8x32xf32>
    %31 = vector.extract_strided_slice %30 {offsets = [0, 0], sizes = [8, 16], strides = [1, 1]} : vector<8x32xf32> to vector<8x16xf32>
    %32 = vector.extract_strided_slice %30 {offsets = [0, 16], sizes = [8, 16], strides = [1, 1]} : vector<8x32xf32> to vector<8x16xf32>
    %cst_25 = arith.constant 5.000000e-01 : f32
    %33 = vector.broadcast %cst_25 : f32 to vector<8x16xf32>
    %34 = arith.mulf %33, %32 : vector<8x16xf32>
    %35 = math.exp %34 : vector<8x16xf32>
    %c0_26 = arith.constant 0 : index
    %c0_27 = arith.constant 0 : index
    %c0_28 = arith.constant 0 : index
    %36 = vector.load %arg4[%c0_26, %c0_27, %c0_28] : memref<1x8x16xf32, #tpu.memory_space<vmem>>, vector<1x8x16xf32>
    %37 = vector.shape_cast %36 : vector<1x8x16xf32> to vector<8x16xf32>
    %38 = arith.mulf %35, %37 : vector<8x16xf32>
    %39 = arith.addf %31, %38 : vector<8x16xf32>
    %40 = tpu.concatenate %31, %35, %39 in 1 : vector<8x16xf32>, vector<8x16xf32>, vector<8x16xf32> -> vector<8x48xf32>
    %c0_29 = arith.constant 0 : index
    %c0_30 = arith.constant 0 : index
    %c0_31 = arith.constant 0 : index
    %41 = vector.load %arg12[%c0_29, %c0_30, %c0_31] : memref<1x8x48xf32, #tpu.memory_space<vmem>>, vector<1x8x48xf32>
    %42 = vector.shape_cast %41 : vector<1x8x48xf32> to vector<8x48xf32>
    %43 = vector.shape_cast %40 : vector<8x48xf32> to vector<1x8x48xf32>
    tpu.vector_store %arg12[%c0_29, %c0_30, %c0_31], %43 {strides = array<i32>} : memref<1x8x48xf32, #tpu.memory_space<vmem>>, vector<1x8x48xf32>,
    return
  }
  func.func @transform_0(%arg0: i32, %arg1: i32) -> (i32, i32, i32) {
    %c0_i32 = arith.constant 0 : i32
    %c0_i32_0 = arith.constant 0 : i32
    return %arg0, %arg1, %c0_i32 : i32, i32, i32
  }
  func.func @transform_1(%arg0: i32, %arg1: i32) -> (i32, i32) {
    %c0_i32 = arith.constant 0 : i32
    %c0_i32_0 = arith.constant 0 : i32
    return %arg1, %c0_i32 : i32, i32
  }
  func.func @transform_2(%arg0: i32, %arg1: i32) -> (i32, i32, i32) {
    %c0_i32 = arith.constant 0 : i32
    %c0_i32_0 = arith.constant 0 : i32
    return %arg0, %arg1, %c0_i32 : i32, i32, i32
  }
  func.func @transform_3(%arg0: i32, %arg1: i32) -> (i32, i32) {
    %c0_i32 = arith.constant 0 : i32
    %c0_i32_0 = arith.constant 0 : i32
    %c0_i32_1 = arith.constant 0 : i32
    return %c0_i32, %c0_i32_0 : i32, i32
  }
  func.func @transform_4(%arg0: i32, %arg1: i32) -> (i32, i32) {
    %c0_i32 = arith.constant 0 : i32
    %c0_i32_0 = arith.constant 0 : i32
    %c0_i32_1 = arith.constant 0 : i32
    return %c0_i32, %c0_i32_0 : i32, i32
  }
  func.func @transform_5(%arg0: i32, %arg1: i32) -> (i32, i32) {
    %c0_i32 = arith.constant 0 : i32
    %c0_i32_0 = arith.constant 0 : i32
    %c0_i32_1 = arith.constant 0 : i32
    return %c0_i32, %c0_i32_0 : i32, i32
  }
  func.func @transform_6(%arg0: i32, %arg1: i32) -> (i32, i32) {
    %c0_i32 = arith.constant 0 : i32
    %c0_i32_0 = arith.constant 0 : i32
    %c0_i32_1 = arith.constant 0 : i32
    return %c0_i32, %c0_i32_0 : i32, i32
  }
  func.func @transform_7(%arg0: i32, %arg1: i32) -> (i32, i32) {
    %c0_i32 = arith.constant 0 : i32
    %c0_i32_0 = arith.constant 0 : i32
    %c0_i32_1 = arith.constant 0 : i32
    return %c0_i32, %c0_i32_0 : i32, i32
  }
  func.func @transform_8(%arg0: i32, %arg1: i32) -> (i32, i32) {
    %c0_i32 = arith.constant 0 : i32
    %c0_i32_0 = arith.constant 0 : i32
    %c0_i32_1 = arith.constant 0 : i32
    return %c0_i32, %c0_i32_0 : i32, i32
  }
  func.func @transform_9(%arg0: i32, %arg1: i32) -> (i32, i32) {
    %c0_i32 = arith.constant 0 : i32
    %c0_i32_0 = arith.constant 0 : i32
    %c0_i32_1 = arith.constant 0 : i32
    return %c0_i32, %c0_i32_0 : i32, i32
  }
  func.func @transform_10(%arg0: i32, %arg1: i32) -> (i32, i32, i32) {
    %c0_i32 = arith.constant 0 : i32
    %c0_i32_0 = arith.constant 0 : i32
    return %arg0, %arg1, %c0_i32 : i32, i32, i32
  }
}

</mosaic_0001>

<bundles_post_ra>
// kernel: tpu_custom_call.1
= control target key start
LH: loop header
LB: loop body
LE: loop exit
PB: predicated region body
PF: predicated region fallthrough
CT: control target
= control target key end

     0   :  { %s1849_s0 = inlined_call_operand.hbm [shape: f32[2,8,8], index: 0, kind: input, shape index: {}]   ;;  %s1850_s1 = inlined_call_operand.hbm [shape: f32[8,8], index: 1, kind: input, shape index: {}]   ;;  %s1851_s2 = inlined_call_operand.hbm [shape: f32[2,8,16], index: 2, kind: input, shape index: {}]   ;;  %s1852_s3 = inlined_call_operand.hbm [shape: f32[8,32], index: 3, kind: input, shape index: {}]   ;;  %s1853_s4 = inlined_call_operand.hbm [shape: f32[8,32], index: 4, kind: input, shape index: {}]   ;;  %s1854_s5 = inlined_call_operand.vmem [shape: f32[1,32], index: 5, kind: input, shape index: {}]   ;;  %s1855_s6 = inlined_call_operand.hbm [shape: f32[32,32], index: 6, kind: input, shape index: {}]   ;;  %s1856_s7 = inlined_call_operand.vmem [shape: f32[1,32], index: 7, kind: input, shape index: {}]   ;;  %s1857_s8 = inlined_call_operand.hbm [shape: f32[32,32], index: 8, kind: input, shape index: {}]   ;;  %s1858_s9 = inlined_call_operand.vmem [shape: f32[1,32], index: 9, kind: input, shape index: {}]   ;;  %s1859_s10 = inlined_call_operand.hbm [shape: f32[2,8,48], index: 10, kind: output, shape index: {}]  }
   0x1   :  { %1873 = sst [smem:[#allocation28_spill]] %s1849_s0 }
   0x2   :  { %1874 = sst [smem:[#allocation29_spill]] %s1850_s1 }
   0x3   :  { %1875 = sst [smem:[#allocation30_spill]] %s1853_s4 }
   0x4   :  { %1876 = sst [smem:[#allocation31_spill]] %s1859_s10 }
   0x5   :  { %15 = vsyncpa [#allocation3], 0 }
   0x6   :  { %17 = vsyncpa [#allocation3 + $0x1], 0 }
   0x7   :  { %18 = vsyncpa [#allocation6], 0 }
   0x8   :  { %19 = vsyncpa [#allocation10], 0 }
   0x9   :  { %20 = vsyncpa [#allocation13], 0 }
   0xa   :  { %21 = vsyncpa [#allocation4], 0 }
   0xb   :  { %23 = vsyncpa [#allocation4 + $0x1], 0  ;;  %s1590_s13 = smov 0   ;;  %s1592_s14 = smov 0  }
   0xc   :  { %s1594_s15 = smov 0   ;;  %s1596_s16 = smov 0  }
   0xd   :  { %s1598_s17 = smov 0   ;;  %s1600_s18 = smov 0  }
   0xe LB: > { %1877 = sst [smem:[#allocation22_spill]] %s1498_s13  ;;  %s1621_s19 = sadd.s32 4294967295, %s1518_s18   ;;  %s1518_s18 = sphi %s1600_s18, %s29_s18   ;;  %s1514_s17 = sphi %s1598_s17, %s1916_s17   ;;  %s1510_s16 = sphi %s1596_s16, %s1915_s16   ;;  %s1506_s15 = sphi %s1594_s15, %s1919_s15   ;;  %s1502_s14 = sphi %s1592_s14, %s1918_s14   ;;  %s1498_s13 = sphi %s1590_s13, %s1917_s13  }
   0xf   : > { %1878 = sst [smem:[#allocation23_spill]] %s1510_s16  ;;  %p1028_p0 = scmp.ge.s32.totalorder %s1518_s18, 1 }
  0x10   : > { %1879 = sst [smem:[#allocation24_spill]] %s1514_s17  ;;  %p1860_p1 = scmp.eq.s32.totalorder %s1621_s19, 0 }
  0x11   : > { %p303_p2 = scmp.lt.s32.totalorder %s1518_s18, 3  ;;  %s1520_s21 = smov [#allocation5]  }
  0x12   : > { %s318_s22 = sshll.u32 %s1520_s21, 4  ;;  %s1521_s23 = smov [#allocation9]   ;;  %s319_s22 = int_to_ptr.vmem [resolvable:$true] %s318_s22 }
  0x13   : > { %p1626_p3 = pnand %p1028_p0, %p303_p2  ;;  %s340_s24 = sshll.u32 %s1521_s23, 4  ;;  %s341_s24 = int_to_ptr.vmem [resolvable:$true] %s340_s24 }
  0x14   : > { %s1243_s27 = scalar_lea.vmem %s319_s22, 128  ;;  %p1251_p11 = scmp.lt.s32.totalorder %s319_s22, %s319_s22 }
  0x15   : > { %s1880_s20 = scalar_select %p1626_p3, 1, 0 }
  0x16   : > { %p1131_p5 = pneg %p1626_p3  ;;  %p1244_p8 = scmp.ne.s32.totalorder %s319_s22, %s1243_s27 }
  0x17   : > { %p1252_p12 = scmp.lt.s32.totalorder %s1243_s27, %s1243_s27 }
  0x18   : > { %p1635_p6 = pnand %p1131_p5, %p1860_p1 }
  0x19   : > { %p1253_p13 = por %p1252_p12, %p1251_p11 }
  0x1a   : > { %p1641_p7 = pneg %p1635_p6 }
  0x1c   : > { %p1246_p9 = pnand %p1244_p8, %p1641_p7 }
  0x1e   : > { %p1247_p10 = pneg %p1246_p9 }
  0x20   : > { %p1254_p0 = pnand %p1253_p13, %p1247_p10 }
  0x22   : > { %1257 = shalt.err (!%p1254_p0)
}
  0x23   : > { %s1883_s1 = sld [smem:[#allocation29_spill]]  ;;  %s1269_s30 = scalar_lea.vmem %s341_s24, 128 }
  0x24   : > { %p1270_p2 = scmp.ne.s32.totalorder %s341_s24, %s1269_s30  ;;  %p1277_p1 = scmp.lt.s32.totalorder %s341_s24, %s341_s24 }
  0x25   : > { %p1278_p8 = scmp.lt.s32.totalorder %s1269_s30, %s1269_s30 }
  0x26   : > { %p1272_p5 = pnand %p1270_p2, %p1641_p7 }
  0x27   : > { %p1279_p9 = por %p1278_p8, %p1277_p1 }
  0x28   : > { %p1273_p4 = pneg %p1272_p5 }
  0x29   : > { %1134 = dma.hbm_to_vmem [thread:$0]  (!%p1635_p6), %s1883_s1, 128, %s319_s22, [#allocation6]  }
  0x2a   : > { %p1280_p3 = pnand %p1279_p9, %p1273_p4 }
  0x2c   : > { %1283 = shalt.err (!%p1280_p3)
}
  0x2d   : > { %s1884_s4 = sld [smem:[#allocation30_spill]]  ;;  %s1027_s21 = sadd.s32 4294967294, %s1518_s18  }
  0x2e   : > { %s41_s22 = sadd.s32 1, %s1514_s17  ;;  %s50_s23 = sadd.s32 1, %s1506_s15 }
  0x2f   : > { %p43_p1 = scmp.ge.s32.totalorder %s41_s22, 2  ;;  %p57_p3 = scmp.ne.s32.totalorder %s1506_s15, %s1502_s14 }
  0x30   : > { %p58_p4 = scmp.eq.s32.totalorder %s1518_s18, 0  ;;  %p63_p11 = scmp.ne.s32.totalorder %s1502_s14, %s1498_s13 }
  0x31   : > { %s1921_s22 = smov (%p43_p1, %s41_s22), 0  ;;  %p290_p12 = scmp.eq.s32.totalorder %s1621_s19, 1 }
  0x32   : > { %1885 = sst [smem:[#allocation25_spill]] %s1921_s22  ;;  %p1667_p10 = por %p58_p4, %p57_p3 }
  0x33   : > { %1140 = dma.hbm_to_vmem [thread:$0]  (!%p1635_p6), %s1884_s4, 128, %s341_s24, [#allocation10]  }
  0x34   : > { %s45_s24 = ssub.s32 %s1514_s17, %s1921_s22  ;;  %p1887_p0 = scmp.eq.s32.totalorder %s1621_s19, 0 }
  0x35   : > { %p48_p13 = scmp.eq.s32.totalorder %s45_s24, 0  ;;  %p1682_p5 = por %p290_p12, %p57_p3 }
  0x36   : > { %p1678_p2 = por %p1887_p0, %p63_p11  ;;  %p296_p8 = scmp.eq.s32.totalorder %s1027_s21, 1 }
  0x37   : > { %s1889_s29 = scalar_select %p1682_p5, 1, 0 }
  0x38   : > { %s1888_s28 = scalar_select %p1678_p2, 1, 0 }
  0x39   : > { %1890 = sst [smem:[#allocation26_spill]] %s1889_s29  ;;  %p1689_p9 = por %p296_p8, %p63_p11 }
  0x3a   : > { %s1687_s30 = scalar_select %p48_p13, %s1506_s15, %s50_s23  }
  0x3b   : > { %s1892_s11 = scalar_select %p1689_p9, 1, 0 }
  0x3c   : > { %1891 = sst [smem:[#allocation27_spill]] %s1687_s30  ;;  %p1163_p1 = scmp.lt.s32.totalorder %s1518_s18, 2 }
  0x3d   : > { %s386_s12 = sand.u32 1, %s1518_s18   ;;  %s388_s1 = sand.u32 1, %s1506_s15  }
  0x3e   : > { %s1696_s24 = sshll.u32 %s388_s1, 3  ;;  %s1036_s4 = sshll.u32 %s1514_s17, 7 }
  0x3f   : > { %s1893_s0 = sld [smem:[#allocation28_spill]]  ;;  %s390_s16 = scalar_lea.vmem [#allocation2], %s1696_s24 }
  0x40   : > { %s398_s29 = sshll.u32 %s390_s16, 4  ;;  %p1705_p3 = pnand %p1163_p1, %p1667_p10  ;;  %s399_s29 = int_to_ptr.vmem [resolvable:$true] %s398_s29 }
  0x41   : > { %s1712_s1 = scalar_lea.hbm %s1851_s2, %s1036_s4  ;;  %s1714_s17 = scalar_lea.sflag [#allocation3], %s386_s12 }
  0x42   : > { %s1894_s21 = scalar_select %p1705_p3, 1, 0 }
  0x43   : > { %p1868_p4 = pneg %p1705_p3  ;;  %s1297_s13 = scalar_lea.vmem %s399_s29, 128 }
  0x44   : > { %p1298_p11 = scmp.ne.s32.totalorder %s399_s29, %s1297_s13  ;;  %s1522_s16 = smov [#allocation2]  }
  0x45   : > { %s396_s10 = scalar_lea.hbm %s1893_s0, %s1036_s4  ;;  %s1302_s22 = sshll.u32 %s1522_s16, 4  ;;  %s1303_s22 = int_to_ptr.vmem [resolvable:$false] %s1302_s22 }
  0x46   : > { %p1300_p12 = pnand %p1298_p11, %p1868_p4  ;;  %s1304_s27 = scalar_lea.vmem %s1303_s22, 256 }
  0x47   : > { %p1305_p13 = scmp.lt.s32.totalorder %s399_s29, %s1303_s22  ;;  %p1306_p0 = scmp.lt.s32.totalorder %s1304_s27, %s1297_s13 }
  0x48   : > { %p1301_p10 = pneg %p1300_p12 }
  0x49   : > { %p1307_p8 = por %p1306_p0, %p1305_p13 }
  0x4b   : > { %p1308_p1 = pnand %p1307_p8, %p1301_p10 }
  0x4d   : > { %1311 = shalt.err (!%p1308_p1)
}
  0x4e   : > { %1150 = dma.hbm_to_vmem [thread:$0]  (!%p1705_p3), %s396_s10, 128, %s399_s29, %s1714_s17  }
  0x4f   : > { %s1523_s4 = smov [#allocation8]   ;;  %s1524_s12 = smov [#allocation11]  }
  0x50   : > { %s329_s30 = sshll.u32 %s1523_s4, 4  ;;  %s353_s23 = sshll.u32 %s1524_s12, 4  ;;  %s330_s30 = int_to_ptr.vmem [resolvable:$true] %s329_s30  ;;  %s354_s23 = int_to_ptr.vmem [resolvable:$true] %s353_s23 }
  0x51   : > { %s1323_s0 = scalar_lea.vmem %s330_s30, 128  ;;  %p1331_p9 = scmp.lt.s32.totalorder %s330_s30, %s330_s30 }
  0x52   : > { %p1324_p11 = scmp.ne.s32.totalorder %s330_s30, %s1323_s0  ;;  %p1332_p5 = scmp.lt.s32.totalorder %s1323_s0, %s1323_s0 }
  0x54   : > { %p1326_p12 = pnand %p1324_p11, %p1641_p7  ;;  %p1333_p13 = por %p1332_p5, %p1331_p9 }
  0x56   : > { %p1327_p4 = pneg %p1326_p12 }
  0x58   : > { %p1334_p10 = pnand %p1333_p13, %p1327_p4 }
  0x5a   : > { %1337 = shalt.err (!%p1334_p10)
}
  0x5b   : > { %1137 = dma.hbm_to_vmem [thread:$0]  (!%p1635_p6), %s1852_s3, 128, %s330_s30, [#allocation6]  }
  0x5c   : > { %s1349_s10 = scalar_lea.vmem %s354_s23, 512  ;;  %p1357_p11 = scmp.lt.s32.totalorder %s354_s23, %s354_s23 }
  0x5d   : > { %p1350_p0 = scmp.ne.s32.totalorder %s354_s23, %s1349_s10  ;;  %p1358_p12 = scmp.lt.s32.totalorder %s1349_s10, %s1349_s10 }
  0x5f   : > { %p1352_p8 = pnand %p1350_p0, %p1641_p7  ;;  %p1359_p2 = por %p1358_p12, %p1357_p11 }
  0x61   : > { %p1353_p1 = pneg %p1352_p8 }
  0x63   : > { %p1360_p3 = pnand %p1359_p2, %p1353_p1 }
  0x65   : > { %1363 = shalt.err (!%p1360_p3)
}
  0x66   : > { %s1525_s0 = smov 128   ;;  %s1526_s29 = smov 8  }
  0x67   : > { %1143 = dma.hbm_to_vmem [thread:$0]  (!%p1635_p6), %s1855_s6, 512, %s354_s23, [#allocation10], %s1525_s0, %s1525_s0, %s1526_s29  }
  0x68   : > { %s1527_s4 = smov [#allocation12]   ;;  %s409_s12 = scalar_lea.vmem [#allocation7], %s1696_s24 }
  0x69   : > { %s369_s30 = sshll.u32 %s1527_s4, 4  ;;  %s417_s13 = sshll.u32 %s409_s12, 4  ;;  %s370_s30 = int_to_ptr.vmem [resolvable:$true] %s369_s30  ;;  %s418_s13 = int_to_ptr.vmem [resolvable:$true] %s417_s13 }
  0x6a   : > { %s1375_s16 = scalar_lea.vmem %s370_s30, 512  ;;  %p1383_p3 = scmp.lt.s32.totalorder %s370_s30, %s370_s30 }
  0x6b   : > { %p1376_p5 = scmp.ne.s32.totalorder %s370_s30, %s1375_s16  ;;  %p1384_p4 = scmp.lt.s32.totalorder %s1375_s16, %s1375_s16 }
  0x6d   : > { %p1378_p2 = pnand %p1376_p5, %p1641_p7  ;;  %p1385_p13 = por %p1384_p4, %p1383_p3 }
  0x6f   : > { %p1379_p9 = pneg %p1378_p2 }
  0x71   : > { %p1386_p10 = pnand %p1385_p13, %p1379_p9 }
  0x73   : > { %1389 = shalt.err (!%p1386_p10)
}
  0x74   : > { %1146 = dma.hbm_to_vmem [thread:$0]  (!%p1635_p6), %s1857_s8, 512, %s370_s30, [#allocation13], %s1525_s0, %s1525_s0, %s1526_s29  }
  0x75   : > { %s1403_s24 = scalar_lea.vmem %s418_s13, 128  ;;  %p1895_p8 = scmp.ne.s32.totalorder %s1894_s21, 0 }
  0x76   : > { %p1404_p0 = scmp.ne.s32.totalorder %s418_s13, %s1403_s24  ;;  %s1528_s26 = smov [#allocation7]  }
  0x77   : > { %p1896_p1 = pneg %p1895_p8  ;;  %s1408_s22 = sshll.u32 %s1528_s26, 4  ;;  %s1409_s22 = int_to_ptr.vmem [resolvable:$false] %s1408_s22 }
  0x78   : > { %s1410_s27 = scalar_lea.vmem %s1409_s22, 256  ;;  %p1411_p7 = scmp.lt.s32.totalorder %s418_s13, %s1409_s22 }
  0x79   : > { %p1406_p11 = pnand %p1404_p0, %p1896_p1  ;;  %p1412_p5 = scmp.lt.s32.totalorder %s1410_s27, %s1403_s24 }
  0x7b   : > { %p1407_p12 = pneg %p1406_p11  ;;  %p1413_p2 = por %p1412_p5, %p1411_p7 }
  0x7d   : > { %p1414_p9 = pnand %p1413_p2, %p1407_p12 }
  0x7f   : > { %1417 = shalt.err (!%p1414_p9)
}
  0x80   : > { %1153 = dma.hbm_to_vmem [thread:$0]  (!%p1895_p8), %s1712_s1, 128, %s418_s13, %s1714_s17  }
  0x81   : > { %p1897_p6 = scmp.ne.s32.totalorder %s1880_s20, 0 }
  0x82   : > { %s428_s25 = sand.u32 (!%p1897_p6), 1, %s1621_s19   ;;  %s430_s0 = sand.u32 (!%p1897_p6), 1, %s1502_s14  }
  0x83   : > { %426 = sbr.rel (%p1897_p6) target bundleno = 1015 (0x3f7), region = 60  ;;  %s1759_s29 = sshll.u32 (!%p1897_p6), %s430_s0, 3 }
  0x84   : > { %s429_s4 = scalar_lea.sflag (!%p1897_p6), [#allocation3], %s428_s25  ;;  %s432_s30 = scalar_lea.vmem (!%p1897_p6), [#allocation2], %s1759_s29 }
  0x85   : > { %p1898_p3 = scmp.ne.s32.totalorder (!%p1897_p6), %s1888_s28, 0 }
  0x88   : > { %1469 = dma.done.wait (%p1898_p3), %s429_s4, 128  }
  0x89   : > { %1471 = vsyncadd (%p1898_p3), %s429_s4, 4294967168  ;;  %p1899_p4 = scmp.eq.s32.totalorder %s1621_s19, 0 }
  0x8b   : > { %1473 = dma.done.wait (%p1899_p4), [#allocation6], 128   ;;  %p1900_p13 = pmov %p1899_p4 }
  0x8c   : > { %s445_s17 = scalar_lea.vmem [#allocation7], %s1759_s29 }
  0x8d   : > { %1475 = vsyncadd (%p1900_p13), [#allocation6], 4294967168 }
  0x8e   : > { %1477 = dma.done.wait (%p1898_p3), %s429_s4, 128  }
  0x8f   : > { %1479 = vsyncadd (%p1898_p3), %s429_s4, 4294967168  ;;  %p1901_p10 = pmov %p1899_p4 }
  0x90   : > { %p1902_p0 = pmov %p1899_p4 }
  0x91   : > { %1481 = dma.done.wait (%p1901_p10), [#allocation6], 128  }
  0x92   : > { %1483 = vsyncadd (%p1902_p0), [#allocation6], 4294967168  ;;  %p1903_p8 = pmov %p1902_p0 }
  0x93   : > { %p1904_p1 = pmov %p1902_p0 }
  0x94   : > { %1485 = dma.done.wait (%p1903_p8), [#allocation10], 640  }
  0x95   : > { %1487 = vsyncadd (%p1904_p1), [#allocation10], 4294966656  ;;  %p1905_p11 = pmov %p1902_p0 }
  0x96   : > { %p1906_p12 = pmov %p1902_p0 }
  0x97   : > { %1489 = dma.done.wait (%p1905_p11), [#allocation13], 512  }
  0x98   : > { %1491 = vsyncadd (%p1906_p12), [#allocation13], 4294966784  ;;  %v1529_v0 = vmov 0.0   ;;  %vm1530_vm0 = vmmov 0   ;;  %vm508_vm1 = vcmask 64512   ;;  %v506_v1 = vld [vmem:[#allocation9] sm:$0xff] }
  0x99   : > { %1073 = vmatprep.subr.mxu0 %v1529_v0  ;;  %1078 = vmatprep.subr.mxu1 %v1529_v0  ;;  %v505_v2 = vld [vmem:[#allocation8] sm:$0xff]  ;;  %v504_v3 = vld [vmem:[#allocation5] sm:$0xff]  ;;  %v666_v7 = vld [vmem:[#allocation11 + $0x8] sm:$0xff]  ;;  %vm676_vm3 = vcmask 261120   ;;  %s1531_s28 = smov 16   ;;  %s1907_s16 = sld [smem:[#allocation23_spill]] }
  0x9a   : > { %1075 = vmatprep.mubr.msk.f32.mxu0 %vm1530_vm0, %v1529_v0  ;;  %1080 = vmatprep.mubr.msk.f32.mxu1 %vm1530_vm0, %v1529_v0  ;;  %v503_v4 = vld [vmem:[%s432_s30] sm:$0xff]  ;;  %v668_v5 = vld [vmem:[#allocation11 + $0x18] sm:$0xff]  ;;  %v665_v8 = vld [vmem:[#allocation11] sm:$0xff]  ;;  %s1532_s10 = smov 112   ;;  %s1533_s23 = smov 32   ;;  %vm855_vm5 = vcmask 130048  }
  0x9b   : > { %1074 = vmatpush3.msra.mxu0 %v506_v1  ;;  %1079 = vmatpush3.msra.mxu1 %v505_v2  ;;  %v667_v6 = vld [vmem:[#allocation11 + $0x10] sm:$0xff]  ;;  %v756_v9 = vld [vmem:[#allocation12 + $0x18] sm:$0xff]  ;;  %v1050_v11 = vld [vmem:[%s1854_s5] ss:$0 sm:$0xff]  ;;  %s1908_s24 = sld [smem:[#allocation26_spill]]  ;;  %s502_s22 = scalar_lea.vmem [#allocation14], %s1759_s29 }
  0x9c   : > { %1076 = vmatmul.mubr.msk.f32.vlgmr.msra.gmra.mxu0 %vm508_vm1, %v504_v3  ;;  %1081 = vmatmul.mubr.msk.f32.vlgmr.msra.gmra.mxu1 %vm508_vm1, %v503_v4  ;;  %v755_v19 = vld [vmem:[#allocation12 + $0x10] sm:$0xff]  ;;  %v754_v20 = vld [vmem:[#allocation12 + $0x8] sm:$0xff]  ;;  %v753_v21 = vld [vmem:[#allocation12] sm:$0xff]  ;;  %s875_s27 = sshll.u32 %s502_s22, 4  ;;  %vm858_vm6 = vcmask 392192   ;;  %s1909_s30 = sld [smem:[#allocation31_spill]]  ;;  %s876_s27 = int_to_ptr.vmem [resolvable:$true] %s875_s27 }
  0x9d   : > { %1083 = vmatprep.subr.mxu0 %v1529_v0  ;;  %1091 = vmatprep.mubr.msk.f32.mxu0 %vm1530_vm0, %v1529_v0  ;;  %v840_v22 = vld [vmem:[%s445_s17] sm:$0xff]  ;;  %s861_s19 = scalar_lea.sflag [#allocation4], %s430_s0  ;;  %s1418_s20 = scalar_lea.vmem %s876_s27, 128 }
  0x9e   : > { %1094 = vmatprep.subr.mxu1 %v1529_v0  ;;  %1102 = vmatprep.mubr.msk.f32.mxu1 %vm1530_vm0, %v1529_v0  ;;  %v1051_v23 = vld [vmem:[%s1856_s7] ss:$0 sm:$0xff]  ;;  %p1419_p7 = scmp.ne.s32.totalorder %s876_s27, %s1418_s20  ;;  %s1534_s29 = smov [#allocation14]  }
  0x9f   : > { %1084 = vmatpush3.msra.mxu0 %v668_v5  ;;  %1095 = vmatpush3.msra.mxu1 %v756_v9  ;;  %v1053_v29 = vld [vmem:[%s1858_s9] ss:$0 sm:$0xff]  ;;  %s1056_s26 = sshll.u32 %s1907_s16, 7 }
  0xa0   : > { %1085 = vmatprep.subr.mxu0 %v1529_v0  ;;  %1096 = vmatprep.subr.mxu1 %v1529_v0 }
  0xa1   : > { %1086 = vmatpush3.msra.mxu0 %v667_v6  ;;  %1097 = vmatpush3.msra.mxu1 %v755_v19  ;;  %p1910_p5 = scmp.ne.s32.totalorder %s1908_s24, 0 }
  0xa2   : > { %1087 = vmatprep.subr.mxu0 %v1529_v0  ;;  %1098 = vmatprep.subr.mxu1 %v1529_v0  ;;  %s1805_s17 = scalar_lea.hbm %s1909_s30, %s1056_s26 }
  0xa3   : > { %1088 = vmatpush3.msra.mxu0 %v666_v7  ;;  %1099 = vmatpush3.msra.mxu1 %v754_v20  ;;  %p1420_p2 = pnand %p1419_p7, %p1910_p5 }
  0xa4   : > { %1089 = vmatprep.subr.mxu0 %v1529_v0  ;;  %1100 = vmatprep.subr.mxu1 %v1529_v0 }
  0xa5   : > { %1090 = vmatpush3.msra.mxu0 %v665_v8  ;;  %1101 = vmatpush3.msra.mxu1 %v753_v21  ;;  %p1421_p9 = pneg %p1420_p2 }
  0xa6   : > { %842 = vrot.lane.b32.xlu0 %v840_v22, %s1531_s28  ;;  %s1422_s28 = sshll.u32 %s1534_s29, 4  ;;  %s1423_s28 = int_to_ptr.vmem [resolvable:$false] %s1422_s28 }
  0xa7   : > { %s1424_s21 = scalar_lea.vmem %s1423_s28, 256  ;;  %p1425_p6 = scmp.lt.s32.totalorder %s876_s27, %s1423_s28 }
  0xa8   : > { %p1426_p3 = scmp.lt.s32.totalorder %s1424_s21, %s1418_s20 }
  0xaa   : > { %p1427_p4 = por %p1426_p3, %p1425_p6 }
  0xac   : > { %p1428_p13 = pnand %p1427_p4, %p1421_p9 }
 0x118   : > { %v843_v35 = vpop.permute.xlu0 %842 }
 0x15c   : > { %v578_v10 = vpop.f32.mrf.mxu0  ;;  %v651_v12 = vpop.f32.mrf.mxu1 }
 0x15d   : > { %v652_v13 = vadd.f32 %v651_v12, %v578_v10 }
 0x15e   : > { %v1077_v14 = vpop.f32.mrf.mxu0  ;;  %v1082_v15 = vpop.f32.mrf.mxu1 }
 0x15f   : > { %v661_v16 = vadd.f32 %v1050_v11, %v652_v13 }
 0x161   : > { %vm662_vm2 = vcmp.gt.f32.partialorder %v661_v16, 0.0  ;;  %v663_v17 = vmul.f32 0.01, %v661_v16 }
 0x163   : > { %v664_v18 = vsel %vm662_vm2, %v661_v16, %v663_v17 }
 0x164   : > { %1092 = vmatmul.mubr.msk.f32.vlgmr.msra.gmra.mxu0 %vm676_vm3, %v664_v18 }
 0x224   : > { %v746_v24 = vpop.f32.mrf.mxu0 }
 0x225   : > { %v747_v25 = vadd.f32 %v1051_v23, %v746_v24 }
 0x226   : > { %v1093_v26 = vpop.f32.mrf.mxu0 }
 0x227   : > { %vm750_vm4 = vcmp.gt.f32.partialorder %v747_v25, 0.0  ;;  %v751_v27 = vmul.f32 0.01, %v747_v25 }
 0x229   : > { %v752_v28 = vsel %vm750_vm4, %v747_v25, %v751_v27 }
 0x22a   : > { %1103 = vmatmul.mubr.msk.f32.vlgmr.msra.gmra.mxu1 %vm676_vm3, %v752_v28 }
 0x2ea   : > { %v833_v30 = vpop.f32.mrf.mxu1 }
 0x2eb   : > { %v834_v31 = vadd.f32 %v1053_v29, %v833_v30 }
 0x2ec   : > { %v1104_v32 = vpop.f32.mrf.mxu1 }
 0x2ed   : > { %v837_v33 = vmul.f32 0.5, %v834_v31 }
 0x2ef   : > { %v838_v34 = vmul.f32 1.442695, %v837_v33 }
 0x2f1   : > { %1230 = vpow2.f32 %v838_v34 }
 0x2fe   : > { %v1231_v36 = vpop.eup %1230 }
 0x2ff   : > { %v845_v37 = vmul.f32 %v1231_v36, %v843_v35  ;;  %v856_v40 = vsel %vm855_vm5, %v834_v31, %v1231_v36 }
 0x301   : > { %847 = vrot.lane.b32.xlu0 %v845_v37, %s1532_s10 }
 0x373   : > { %v848_v38 = vpop.permute.xlu0 %847 }
 0x374   : > { %v850_v39 = vadd.f32 %v848_v38, %v834_v31 }
 0x376   : > { %852 = vrot.lane.b32.xlu1 %v850_v39, %s1533_s23 }
 0x3e8   : > { %v853_v41 = vpop.permute.xlu1 %852 }
 0x3e9   : > { %v857_v42 = vsel %vm676_vm3, %v856_v40, %v853_v41 }
 0x3ea   : > { %859 = vst.msk [vmem:[%s502_s22] sm:$0xff] %vm858_vm6, %v857_v42 }
 0x3eb   : > { %1431 = shalt.err (!%p1428_p13)
}
 0x3ec   : > { %s1432_s1 = scalar_lea.hbm %s1805_s17, 128  ;;  %s1436_s13 = scalar_lea.hbm %s1909_s30, 256 }
 0x3ed   : > { %p1433_p10 = scmp.ne.s32.totalorder %s1805_s17, %s1432_s1  ;;  %p1437_p1 = scmp.lt.s32.totalorder %s1805_s17, %s1909_s30 }
 0x3ee   : > { %p1438_p11 = scmp.lt.s32.totalorder %s1436_s13, %s1432_s1 }
 0x3ef   : > { %p1434_p0 = pnand %p1433_p10, %p1910_p5 }
 0x3f0   : > { %p1439_p12 = por %p1438_p11, %p1437_p1 }
 0x3f1   : > { %p1435_p8 = pneg %p1434_p0 }
 0x3f3   : > { %p1440_p7 = pnand %p1439_p12, %p1435_p8 }
 0x3f5   : > { %1443 = shalt.err (!%p1440_p7)
}
 0x3f6   : > { %1129 = dma.vmem_to_hbm [thread:$0]  (%p1910_p5), %s876_s27, 128, %s1805_s17, %s861_s19  }
 0x3f7 PF: > { %s1911_s23 = sld [smem:[#allocation22_spill]]  ;;  %p1912_p2 = scmp.ne.s32.totalorder %s1892_s11, 0 }
 0x3f8   : > { %p1913_p9 = scmp.ge.s32.totalorder %s1518_s18, 2 }
 0x3fa   : > { %p1155_p6 = pnand %p1913_p9, %p1912_p2 }
 0x3fc   : > { %p1156_p3 = pneg %p1155_p6 }
 0x3fd   : > { %s887_s26 = sand.u32 1, %s1911_s23  }
 0x3fe   : > { %s888_s22 = scalar_lea.sflag [#allocation4], %s887_s26 }
 0x3ff   : > { %1493 = dma.done.wait (%p1156_p3), %s888_s22, 128  }
 0x400   : > { %1495 = vsyncadd (%p1156_p3), %s888_s22, 4294967168  ;;  %s29_s18 = sadd.s32 1, %s1518_s18   ;;  %s1914_s24 = sld [smem:[#allocation27_spill]] }
 0x401   : > { %p26_p4 = scmp.ge.s32.totalorder %s29_s18, 4   ;;  %s1915_s16 = sld [smem:[#allocation24_spill]] }
 0x402   : > { %s1916_s17 = sld [smem:[#allocation25_spill]]  ;;  %s1917_s13 = smov %s1502_s14 }
 0x403   : > { %s1918_s14 = smov %s1506_s15  ;;  %28 = sbr.rel (!%p26_p4) target bundleno = 14 (0xe), region = 137 }
 0x406   : > { %s1919_s15 = smov %s1914_s24 }
 0x408   :  { %893 = vsyncpa [#allocation3], 1 }
 0x409   :  { %895 = vsyncpa [#allocation3 + $0x1], 1 }
 0x40a   :  { %896 = vsyncpa [#allocation6], 1 }
 0x40b   :  { %897 = vsyncpa [#allocation10], 1 }
 0x40c   :  { %898 = vsyncpa [#allocation13], 1 }
 0x40d   :  { %899 = vsyncpa [#allocation4], 1 }
 0x40e   :  { %901 = vsyncpa [#allocation4 + $0x1], 1 }

</bundles_post_ra>
